<compile_context>
chip_gen: v5e
topology: v5e:2x2
jax: 0.10.0
libtpu: 0.0.40
codegen_flags: <defaults>
</compile_context>

<pallas_src>
import functools

import jax
import jax.numpy as jnp
from jax.experimental import pallas as pl
from jax.experimental.pallas import tpu as pltpu


def _round_up(v, m):
    return ((v + m - 1) // m) * m


# ---------------------------------------------------------------------------
# Kernel body
# ---------------------------------------------------------------------------
def _last_spiking_kernel(x_ref, w_ref, b_ref, o_ref, *, inv_T):
    """One grid step = one batch tile:

        o = (sum_t x[:, t, :]) @ W * (1/T) + b

    Linearity of the fc layer lets us reduce over T *before* the matmul:
    T-fold fewer MXU pushes and a single HBM pass over x.
    """
    # x_ref: (tb, T, F)  w_ref: (F, Cp)  b_ref: (1, Cp)  o_ref: (tb, Cp)
    # Accumulate the T-reduction in f32 regardless of x dtype (bf16-safe).
    s = jnp.sum(x_ref[...].astype(jnp.float32), axis=1)          # (tb, F)
    # NOTE: kernel is HBM-bound; only if a bundle dump showed this axis-1
    # reduce lowering to relayout/XLU churn would we swap it for an unrolled
    # fori_loop over 2-D (tb, F) slices (per review: don't pay for it blindly).
    o = (
        jnp.dot(s, w_ref[...], preferred_element_type=jnp.float32) * inv_T
        + b_ref[...]                                              # (1, Cp) bcast
    )
    o_ref[...] = o.astype(o_ref.dtype)


# ---------------------------------------------------------------------------
# VMEM / tiling plumbing
# ---------------------------------------------------------------------------
def _vmem_capacity_bytes():
    """Physical VMEM of the current chip (128 MiB v5e/v6e, 64 MiB v7x)."""
    try:
        cap = int(pltpu.get_tpu_info().vmem_capacity_bytes)
        if cap > 0:
            return cap
    except Exception:
        pass
    return 64 << 20        # conservative fallback (v7x per-TC VMEM)


def _pick_tb(B, T, F, Cp, x_itemsize, w_itemsize, budget_bytes):
    """Largest 8-aligned batch tile whose *padded* VMEM footprint fits
    `budget_bytes`, capped so the grid keeps multiple steps."""
    Tp = _round_up(T, 8)        # sublane padding of the (T, F) x tile
    Fp = _round_up(F, 128)      # lane padding of the (T, F) x tile
    # tb-independent buffers (counted double-buffered to stay conservative
    # even if the Buffered(1) request is unavailable): weight + bias.
    fixed = 2 * _round_up(F, 8) * Cp * w_itemsize + 2 * 8 * Cp * w_itemsize
    # Per-batch-row bytes: double-buffered x block + double-buffered output.
    per_row = 2 * Tp * Fp * x_itemsize + 2 * Cp * x_itemsize
    avail = budget_bytes - fixed
    if avail >= per_row * 8:
        max_tb = (avail // per_row) // 8 * 8
    else:
        # Degenerate (enormous T*F): even tb=8 busts the budget; a T/F-tiled
        # variant would be needed. Fall back to the smallest legal tile.
        max_tb = 8

    if B <= 8:
        return B                # single full block (block dim == array dim)

    # Keep the grid multi-step: overlap the x DMA with compute and give the
    # second TensorCore (v7x) a share of the "parallel" batch axis.
    target_steps = 4 if B >= 32 else 2
    cap = max(8, (B // (target_steps * 8)) * 8)
    max_tb = min(max_tb, cap)

    tb = min(max_tb, _round_up(B, 8))
    return B if tb >= B else tb


# ---------------------------------------------------------------------------
# Wrapper
# ---------------------------------------------------------------------------
def last_spiking(x, weight, bias, T):
    """x: [B, T, F] (PyTorch layout). weight: [C, F], bias: [C] (nn.Linear)."""
    B, T_in, F = x.shape
    assert T_in == T
    C = weight.shape[0]

    # --- wrapper-side layout plumbing (tiny tensors only; no pass over x) --
    # Lane-dense classifier: pad C to the next multiple of 128 (unmasked vst,
    # clean MXU N). Stop at 128 — growing further only inflates the output
    # write for zero end-to-end gain.
    Cp = _round_up(C, 128)
    w_fc = jnp.transpose(weight, (1, 0))                  # (F, C)
    if Cp != C:
        w_fc = jnp.pad(w_fc, ((0, 0), (0, Cp - C)))
        b_p = jnp.pad(bias, (0, Cp - C))
    else:
        b_p = bias
    b_1c = b_p.reshape(1, Cp)

    # --- per-generation VMEM plumbing ---------------------------------------
    vmem_cap = _vmem_capacity_bytes()
    vmem_limit = min(vmem_cap * 3 // 4, 100 << 20)        # ~96 MiB v5e/v6e, ~48 MiB v7x
    budget = int(vmem_limit * 0.85)                        # headroom inside the limit

    tb = _pick_tb(B, T, F, Cp,
                  x_itemsize=x.dtype.itemsize,
                  w_itemsize=w_fc.dtype.itemsize,
                  budget_bytes=budget)
    grid = (pl.cdiv(B, tb),)

    kernel = functools.partial(_last_spiking_kernel, inv_T=1.0 / float(T))

    cost = pl.CostEstimate(
        flops=2 * B * F * Cp + B * T * F,
        transcendentals=0,
        bytes_accessed=(B * T * F * x.dtype.itemsize
                        + F * Cp * w_fc.dtype.itemsize
                        + Cp * b_p.dtype.itemsize
                        + B * Cp * x.dtype.itemsize),
    )

    def _call(single_buffer_consts):
        if single_buffer_consts:
            # Constant index maps -> one VMEM buffer is enough; the freed
            # headroom goes straight into a larger batch tile.
            const_spec = lambda shape, imap: pl.BlockSpec(
                shape, imap, pipeline_mode=pl.Buffered(1))
        else:
            const_spec = lambda shape, imap: pl.BlockSpec(shape, imap)
        return pl.pallas_call(
            kernel,
            out_shape=jax.ShapeDtypeStruct((B, Cp), x.dtype),
            grid_spec=pltpu.PrefetchScalarGridSpec(
                num_scalar_prefetch=0,
                grid=grid,
                in_specs=[
                    # x tiled over B only; T and F stay whole inside the block.
                    pl.BlockSpec((tb, T, F), lambda i: (i, 0, 0)),
                    const_spec((F, Cp), lambda i: (0, 0)),
                    const_spec((1, Cp), lambda i: (0, 0)),
                ],
                out_specs=pl.BlockSpec((tb, Cp), lambda i: (i, 0)),
            ),
            compiler_params=pltpu.CompilerParams(
                dimension_semantics=("parallel",),   # independent batch tiles
                vmem_limit_bytes=int(vmem_limit),
            ),
            cost_estimate=cost,
        )(x, w_fc, b_1c)

    try:
        out_padded = _call(True)
    except Exception:
        # Pallas versions without pipeline_mode / Buffered(1): fall back to
        # double-buffered constants (budget already reserves space for that).
        out_padded = _call(False)

    return out_padded[:, :C]


def _reference(x, weight, bias, T):
    B, T_in, F = x.shape
    y = x.reshape(B * T_in, F) @ weight.T + bias          # block(x.flatten(0,1))
    y = y.reshape(B, T_in, -1)
    return y.sum(axis=1) / T


if __name__ == "__main__":
    key = jax.random.PRNGKey(0)

    # -- primary small shape (matches the module's readout head) ------------
    B, T, F, C = 4, 8, 32, 16
    kx, kw, kb, key = jax.random.split(key, 4)
    x = jax.random.normal(kx, (B, T, F), dtype=jnp.float32)
    weight = jax.random.normal(kw, (C, F), dtype=jnp.float32) * 0.1
    bias = jax.random.normal(kb, (C,), dtype=jnp.float32) * 0.1

    out = jax.block_until_ready(last_spiking(x, weight, bias, T))
    ref = _reference(x, weight, bias, T)
    assert out.shape == (B, C)
    assert jnp.allclose(out, ref, rtol=1e-5, atol=1e-5)

    # -- secondary shape: multi-step grid with a ragged last batch tile -----
    B2, T2, F2, C2 = 20, 6, 40, 10
    kx, kw, kb, key = jax.random.split(key, 4)
    x2 = jax.random.normal(kx, (B2, T2, F2), dtype=jnp.float32)
    w2 = jax.random.normal(kw, (C2, F2), dtype=jnp.float32) * 0.1
    b2 = jax.random.normal(kb, (C2,), dtype=jnp.float32) * 0.1

    out2 = jax.block_until_ready(last_spiking(x2, w2, b2, T2))
    ref2 = _reference(x2, w2, b2, T2)
    assert out2.shape == (B2, C2)
    assert jnp.allclose(out2, ref2, rtol=1e-5, atol=1e-5)

    print("KERNEL_OK")
</pallas_src>

<mosaic_0001>
module attributes {stable_mosaic.version = 11 : i64} {
  func.func @_last_spiking_kernel(%arg0: i32, %arg1: memref<4x8x32xf32, #tpu.memory_space<vmem>>, %arg2: memref<32x128xf32, #tpu.memory_space<vmem>>, %arg3: memref<1x128xf32, #tpu.memory_space<vmem>>, %arg4: memref<4x128xf32, #tpu.memory_space<vmem>>) attributes {dimension_semantics = [#tpu.dimension_semantics<parallel>], iteration_bounds = array<i64: 1>, scalar_prefetch = 0 : i64, scratch_operands = 0 : i64, tpu.core_type = #tpu.core_type<tc>, window_params = [{transform_indices = @transform_0, window_bounds = array<i64: 4, 8, 32>}, {pipeline_mode = #tpu.pipeline_mode<synchronous>, transform_indices = @transform_1, window_bounds = array<i64: 32, 128>}, {pipeline_mode = #tpu.pipeline_mode<synchronous>, transform_indices = @transform_2, window_bounds = array<i64: 1, 128>}, {transform_indices = @transform_3, window_bounds = array<i64: 4, 128>}]} {
    %c0 = arith.constant 0 : index
    %c0_0 = arith.constant 0 : index
    %c0_1 = arith.constant 0 : index
    %0 = vector.load %arg1[%c0, %c0_0, %c0_1] : memref<4x8x32xf32, #tpu.memory_space<vmem>>, vector<4x8x32xf32>
    %cst = arith.constant dense<0.000000e+00> : vector<4x32xf32>
    %1 = vector.multi_reduction <add>, %0, %cst [1] : vector<4x8x32xf32> to vector<4x32xf32>
    %c0_2 = arith.constant 0 : index
    %c0_3 = arith.constant 0 : index
    %2 = vector.load %arg2[%c0_2, %c0_3] : memref<32x128xf32, #tpu.memory_space<vmem>>, vector<32x128xf32>
    %cst_4 = arith.constant dense<0.000000e+00> : vector<4x128xf32>
    %3 = tpu.matmul %1, %2, %cst_4 {dimension_numbers = #tpu.dot_dimension_numbers<[1], [0], [0], [1], [0, 0, 1, 1], [], []>} : vector<4x32xf32>, vector<32x128xf32>, vector<4x128xf32> -> vector<4x128xf32>
    %cst_5 = arith.constant 1.250000e-01 : f32
    %4 = vector.broadcast %cst_5 : f32 to vector<4x128xf32>
    %5 = arith.mulf %3, %4 : vector<4x128xf32>
    %c0_6 = arith.constant 0 : index
    %c0_7 = arith.constant 0 : index
    %6 = vector.load %arg3[%c0_6, %c0_7] : memref<1x128xf32, #tpu.memory_space<vmem>>, vector<1x128xf32>
    %7 = vector.broadcast %6 : vector<1x128xf32> to vector<4x128xf32>
    %8 = arith.addf %5, %7 : vector<4x128xf32>
    %c0_8 = arith.constant 0 : index
    %c0_9 = arith.constant 0 : index
    %9 = vector.load %arg4[%c0_8, %c0_9] : memref<4x128xf32, #tpu.memory_space<vmem>>, vector<4x128xf32>
    tpu.vector_store %arg4[%c0_8, %c0_9], %8 {strides = array<i32>} : memref<4x128xf32, #tpu.memory_space<vmem>>, vector<4x128xf32>,
    return
  }
  func.func @transform_0(%arg0: i32) -> (i32, i32, i32) {
    %c0_i32 = arith.constant 0 : i32
    %c0_i32_0 = arith.constant 0 : i32
    %c0_i32_1 = arith.constant 0 : i32
    return %arg0, %c0_i32, %c0_i32_0 : i32, i32, i32
  }
  func.func @transform_1(%arg0: i32) -> (i32, i32) {
    %c0_i32 = arith.constant 0 : i32
    %c0_i32_0 = arith.constant 0 : i32
    %c0_i32_1 = arith.constant 0 : i32
    return %c0_i32, %c0_i32_0 : i32, i32
  }
  func.func @transform_2(%arg0: i32) -> (i32, i32) {
    %c0_i32 = arith.constant 0 : i32
    %c0_i32_0 = arith.constant 0 : i32
    %c0_i32_1 = arith.constant 0 : i32
    return %c0_i32, %c0_i32_0 : i32, i32
  }
  func.func @transform_3(%arg0: i32) -> (i32, i32) {
    %c0_i32 = arith.constant 0 : i32
    %c0_i32_0 = arith.constant 0 : i32
    return %arg0, %c0_i32 : i32, i32
  }
}

module attributes {stable_mosaic.version = 11 : i64} {
  func.func @_last_spiking_kernel(%arg0: i32, %arg1: memref<4x8x32xf32, #tpu.memory_space<vmem>>, %arg2: memref<32x128xf32, #tpu.memory_space<vmem>>, %arg3: memref<1x128xf32, #tpu.memory_space<vmem>>, %arg4: memref<4x128xf32, #tpu.memory_space<vmem>>) attributes {dimension_semantics = [#tpu.dimension_semantics<parallel>], iteration_bounds = array<i64: 1>, scalar_prefetch = 0 : i64, scratch_operands = 0 : i64, tpu.core_type = #tpu.core_type<tc>, window_params = [{transform_indices = @transform_0, window_bounds = array<i64: 4, 8, 32>}, {pipeline_mode = #tpu.pipeline_mode<synchronous>, transform_indices = @transform_1, window_bounds = array<i64: 32, 128>}, {pipeline_mode = #tpu.pipeline_mode<synchronous>, transform_indices = @transform_2, window_bounds = array<i64: 1, 128>}, {transform_indices = @transform_3, window_bounds = array<i64: 4, 128>}]} {
    %c0 = arith.constant 0 : index
    %c0_0 = arith.constant 0 : index
    %c0_1 = arith.constant 0 : index
    %0 = vector.load %arg1[%c0, %c0_0, %c0_1] : memref<4x8x32xf32, #tpu.memory_space<vmem>>, vector<4x8x32xf32>
    %cst = arith.constant dense<0.000000e+00> : vector<4x32xf32>
    %1 = vector.multi_reduction <add>, %0, %cst [1] : vector<4x8x32xf32> to vector<4x32xf32>
    %c0_2 = arith.constant 0 : index
    %c0_3 = arith.constant 0 : index
    %2 = vector.load %arg2[%c0_2, %c0_3] : memref<32x128xf32, #tpu.memory_space<vmem>>, vector<32x128xf32>
    %cst_4 = arith.constant dense<0.000000e+00> : vector<4x128xf32>
    %3 = tpu.matmul %1, %2, %cst_4 {dimension_numbers = #tpu.dot_dimension_numbers<[1], [0], [0], [1], [0, 0, 1, 1], [], []>} : vector<4x32xf32>, vector<32x128xf32>, vector<4x128xf32> -> vector<4x128xf32>
    %cst_5 = arith.constant 1.250000e-01 : f32
    %4 = vector.broadcast %cst_5 : f32 to vector<4x128xf32>
    %5 = arith.mulf %3, %4 : vector<4x128xf32>
    %c0_6 = arith.constant 0 : index
    %c0_7 = arith.constant 0 : index
    %6 = vector.load %arg3[%c0_6, %c0_7] : memref<1x128xf32, #tpu.memory_space<vmem>>, vector<1x128xf32>
    %7 = vector.broadcast %6 : vector<1x128xf32> to vector<4x128xf32>
    %8 = arith.addf %5, %7 : vector<4x128xf32>
    %c0_8 = arith.constant 0 : index
    %c0_9 = arith.constant 0 : index
    %9 = vector.load %arg4[%c0_8, %c0_9] : memref<4x128xf32, #tpu.memory_space<vmem>>, vector<4x128xf32>
    tpu.vector_store %arg4[%c0_8, %c0_9], %8 {strides = array<i32>} : memref<4x128xf32, #tpu.memory_space<vmem>>, vector<4x128xf32>,
    return
  }
  func.func @transform_0(%arg0: i32) -> (i32, i32, i32) {
    %c0_i32 = arith.constant 0 : i32
    %c0_i32_0 = arith.constant 0 : i32
    %c0_i32_1 = arith.constant 0 : i32
    return %arg0, %c0_i32, %c0_i32_0 : i32, i32, i32
  }
  func.func @transform_1(%arg0: i32) -> (i32, i32) {
    %c0_i32 = arith.constant 0 : i32
    %c0_i32_0 = arith.constant 0 : i32
    %c0_i32_1 = arith.constant 0 : i32
    return %c0_i32, %c0_i32_0 : i32, i32
  }
  func.func @transform_2(%arg0: i32) -> (i32, i32) {
    %c0_i32 = arith.constant 0 : i32
    %c0_i32_0 = arith.constant 0 : i32
    %c0_i32_1 = arith.constant 0 : i32
    return %c0_i32, %c0_i32_0 : i32, i32
  }
  func.func @transform_3(%arg0: i32) -> (i32, i32) {
    %c0_i32 = arith.constant 0 : i32
    %c0_i32_0 = arith.constant 0 : i32
    return %arg0, %c0_i32 : i32, i32
  }
}

</mosaic_0001>

<bundles_post_ra>
// kernel: tpu_custom_call.1
= control target key start
LH: loop header
LB: loop body
LE: loop exit
PB: predicated region body
PF: predicated region fallthrough
CT: control target
= control target key end

     0   :  { %8 = vsyncpa [#allocation3], 0  ;;  %s268_s0 = inlined_call_operand.hbm [shape: f32[4,8,32], index: 0, kind: input, shape index: {}]   ;;  %s269_s1 = inlined_call_operand.hbm [shape: f32[32,128], index: 1, kind: input, shape index: {}]   ;;  %s270_s2 = inlined_call_operand.vmem [shape: f32[1,128], index: 2, kind: input, shape index: {}]   ;;  %s271_s3 = inlined_call_operand.hbm [shape: f32[4,128], index: 3, kind: output, shape index: {}]  }
   0x1   :  { %9 = vsyncpa [#allocation6], 0 }
   0x2   :  { %10 = vsyncpa [#allocation4], 0  ;;  %s15_s14 = sshll.u32 %s268_s0, 4  ;;  %s226_s15 = smov [#allocation2]   ;;  %s16_s14 = int_to_ptr.hbm [resolvable:$true] %s15_s14 }
   0x3   :  { %s17_s16 = sshll.u32 %s226_s15, 4  ;;  %s28_s19 = sshll.u32 %s269_s1, 4  ;;  %s18_s16 = int_to_ptr.vmem [resolvable:$true] %s17_s16  ;;  %s29_s19 = int_to_ptr.hbm [resolvable:$true] %s28_s19 }
   0x4   :  { %s227_s20 = smov 128   ;;  %s228_s21 = smov 8  }
   0x5   :  { %23 = dma.hbm_to_vmem [thread:$0]  %s16_s14, 512, %s18_s16, [#allocation3], %s227_s20, %s227_s20, %s228_s21  }
   0x6   :  { %s229_s22 = smov [#allocation5]  }
   0x7   :  { %s30_s23 = sshll.u32 %s229_s22, 4  ;;  %s31_s23 = int_to_ptr.vmem [resolvable:$true] %s30_s23 }
   0x8   :  { %36 = dma.hbm_to_vmem [thread:$0]  %s29_s19, 512, %s31_s23, [#allocation6], %s227_s20, %s227_s20, %s228_s21  }
   0x9   :  { %220 = dma.done.wait [#allocation3], 512  }
   0xa   :  { %221 = vsyncadd [#allocation3], 4294966784 }
   0xb   :  { %222 = dma.done.wait [#allocation6], 512  }
   0xc   :  { %223 = vsyncadd [#allocation6], 4294966784  ;;  %vm51_vm0 = vcmask 261120   ;;  %v83_v0 = vld [vmem:[#allocation5 + $0x18] sm:$0xff]  ;;  %v82_v1 = vld [vmem:[#allocation5 + $0x10] sm:$0xff]  ;;  %vm88_vm1 = vcmask 1041409  }
   0xd   :  { %108 = vmatpush.msra.mxu0 %v83_v0  ;;  %v81_v2 = vld [vmem:[#allocation5 + $0x8] sm:$0xff]  ;;  %v47_v3 = vld [vmem:[#allocation2] sm:$0xff]  ;;  %v49_v5 = vld [vmem:[#allocation2 + $0x10] sm:$0xff]  ;;  %vm90_vm2 = vcmask 1042434   ;;  %vm92_vm3 = vcmask 1043459   ;;  %s230_s24 = smov [#allocation7]  }
   0xe   :  { %v48_v4 = vld [vmem:[#allocation2 + $0x8] sm:$0xff]  ;;  %v50_v6 = vld [vmem:[#allocation2 + $0x18] sm:$0xff]  ;;  %v52_v7 = vsel %vm51_vm0, %v47_v3, 0.0  ;;  %v66_v11 = vsel %vm51_vm0, %v49_v5, 0.0  ;;  %v80_v13 = vld [vmem:[#allocation5] sm:$0xff]  ;;  %s128_s25 = sshll.u32 %s230_s24, 4  ;;  %s129_s25 = int_to_ptr.vmem [resolvable:$true] %s128_s25 }
   0xf   :  { %v59_v8 = vsel %vm51_vm0, %v48_v4, 0.0  ;;  %109 = vmatpush.msra.mxu0 %v82_v1  ;;  %v53_v9 = vrot.slane %v52_v7, 4  ;;  %v73_v12 = vsel %vm51_vm0, %v50_v6, 0.0  ;;  %v67_v14 = vrot.slane %v66_v11, 4  ;;  %v147_v39 = vld [vmem:[%s270_s2] ss:$0 sm:$0xff] }
  0x10   :  { %v60_v10 = vrot.slane %v59_v8, 4  ;;  %v74_v15 = vrot.slane %v73_v12, 4  ;;  %s130_s28 = sshll.u32 %s271_s3, 4  ;;  %s131_s28 = int_to_ptr.hbm [resolvable:$true] %s130_s28 }
  0x11   :  { %110 = vmatpush.msra.mxu0 %v81_v2  ;;  %v54_v16 = vadd.f32 %v53_v9, %v52_v7  ;;  %v68_v18 = vadd.f32 %v67_v14, %v66_v11 }
  0x12   :  { %v61_v17 = vadd.f32 %v60_v10, %v59_v8  ;;  %v75_v19 = vadd.f32 %v74_v15, %v73_v12 }
  0x13   :  { %111 = vmatpush.msra.mxu0 %v80_v13  ;;  %v55_v20 = vrot.slane %v54_v16, 2  ;;  %v69_v22 = vrot.slane %v68_v18, 2 }
  0x14   :  { %v62_v21 = vrot.slane %v61_v17, 2  ;;  %v76_v23 = vrot.slane %v75_v19, 2 }
  0x15   :  { %v56_v24 = vadd.f32 %v55_v20, %v54_v16  ;;  %v70_v26 = vadd.f32 %v69_v22, %v68_v18 }
  0x16   :  { %v63_v25 = vadd.f32 %v62_v21, %v61_v17  ;;  %v77_v27 = vadd.f32 %v76_v23, %v75_v19 }
  0x17   :  { %v57_v28 = vrot.slane %v56_v24, 1  ;;  %v71_v30 = vrot.slane %v70_v26, 1 }
  0x18   :  { %v64_v29 = vrot.slane %v63_v25, 1  ;;  %v78_v31 = vrot.slane %v77_v27, 1 }
  0x19   :  { %v58_v32 = vadd.f32 %v57_v28, %v56_v24  ;;  %v72_v34 = vadd.f32 %v71_v30, %v70_v26 }
  0x1a   :  { %v65_v33 = vadd.f32 %v64_v29, %v63_v25  ;;  %v79_v35 = vadd.f32 %v78_v31, %v77_v27 }
  0x1c   :  { %v89_v36 = vsel %vm88_vm1, %v65_v33, %v58_v32 }
  0x1d   :  { %v91_v37 = vsel %vm90_vm2, %v72_v34, %v89_v36 }
  0x1e   :  { %v93_v38 = vsel %vm92_vm3, %v79_v35, %v91_v37 }
  0x1f   :  { %141 = vmatmul.msk.f32.vlgmr.msra.gmra.mxu0 %vm51_vm0, %v93_v38 }
  0x9c   :  { %v113_v40 = vpop.f32.mrf.mxu0 }
  0x9d   :  { %v116_v41 = vmul.f32 0.125, %v113_v40 }
  0x9f   :  { %v121_v42 = vadd.f32 %v147_v39, %v116_v41 }
  0xa1   :  { %122 = vst [vmem:[#allocation7] sm:$0xf] %v121_v42 }
  0xa2   :  { %133 = dma.vmem_to_hbm [thread:$0]  %s129_s25, 64, %s131_s28, [#allocation4]  }
  0xa3   :  { %224 = dma.done.wait [#allocation4], 64  }
  0xa4   :  { %225 = vsyncadd [#allocation4], 4294967232 }
  0xa5   :  { %138 = vsyncpa [#allocation3], 1 }
  0xa6   :  { %139 = vsyncpa [#allocation6], 1 }
  0xa7   :  { %140 = vsyncpa [#allocation4], 1 }

// kernel: tpu_custom_call.1
= control target key start
LH: loop header
LB: loop body
LE: loop exit
PB: predicated region body
PF: predicated region fallthrough
CT: control target
= control target key end

     0   :  { %8 = vsyncpa [#allocation3], 0  ;;  %s268_s0 = inlined_call_operand.hbm [shape: f32[4,8,32], index: 0, kind: input, shape index: {}]   ;;  %s269_s1 = inlined_call_operand.hbm [shape: f32[32,128], index: 1, kind: input, shape index: {}]   ;;  %s270_s2 = inlined_call_operand.vmem [shape: f32[1,128], index: 2, kind: input, shape index: {}]   ;;  %s271_s3 = inlined_call_operand.hbm [shape: f32[4,128], index: 3, kind: output, shape index: {}]  }
   0x1   :  { %9 = vsyncpa [#allocation6], 0 }
   0x2   :  { %10 = vsyncpa [#allocation4], 0  ;;  %s15_s14 = sshll.u32 %s268_s0, 4  ;;  %s226_s15 = smov [#allocation2]   ;;  %s16_s14 = int_to_ptr.hbm [resolvable:$true] %s15_s14 }
   0x3   :  { %s17_s16 = sshll.u32 %s226_s15, 4  ;;  %s28_s19 = sshll.u32 %s269_s1, 4  ;;  %s18_s16 = int_to_ptr.vmem [resolvable:$true] %s17_s16  ;;  %s29_s19 = int_to_ptr.hbm [resolvable:$true] %s28_s19 }
   0x4   :  { %s227_s20 = smov 128   ;;  %s228_s21 = smov 8  }
   0x5   :  { %23 = dma.hbm_to_vmem [thread:$0]  %s16_s14, 512, %s18_s16, [#allocation3], %s227_s20, %s227_s20, %s228_s21  }
   0x6   :  { %s229_s22 = smov [#allocation5]  }
   0x7   :  { %s30_s23 = sshll.u32 %s229_s22, 4  ;;  %s31_s23 = int_to_ptr.vmem [resolvable:$true] %s30_s23 }
   0x8   :  { %36 = dma.hbm_to_vmem [thread:$0]  %s29_s19, 512, %s31_s23, [#allocation6], %s227_s20, %s227_s20, %s228_s21  }
   0x9   :  { %220 = dma.done.wait [#allocation3], 512  }
   0xa   :  { %221 = vsyncadd [#allocation3], 4294966784 }
   0xb   :  { %222 = dma.done.wait [#allocation6], 512  }
   0xc   :  { %223 = vsyncadd [#allocation6], 4294966784  ;;  %vm51_vm0 = vcmask 261120   ;;  %v83_v0 = vld [vmem:[#allocation5 + $0x18] sm:$0xff]  ;;  %v82_v1 = vld [vmem:[#allocation5 + $0x10] sm:$0xff]  ;;  %vm88_vm1 = vcmask 1041409  }
   0xd   :  { %108 = vmatpush.msra.mxu0 %v83_v0  ;;  %v81_v2 = vld [vmem:[#allocation5 + $0x8] sm:$0xff]  ;;  %v47_v3 = vld [vmem:[#allocation2] sm:$0xff]  ;;  %v49_v5 = vld [vmem:[#allocation2 + $0x10] sm:$0xff]  ;;  %vm90_vm2 = vcmask 1042434   ;;  %vm92_vm3 = vcmask 1043459   ;;  %s230_s24 = smov [#allocation7]  }
   0xe   :  { %v48_v4 = vld [vmem:[#allocation2 + $0x8] sm:$0xff]  ;;  %v50_v6 = vld [vmem:[#allocation2 + $0x18] sm:$0xff]  ;;  %v52_v7 = vsel %vm51_vm0, %v47_v3, 0.0  ;;  %v66_v11 = vsel %vm51_vm0, %v49_v5, 0.0  ;;  %v80_v13 = vld [vmem:[#allocation5] sm:$0xff]  ;;  %s128_s25 = sshll.u32 %s230_s24, 4  ;;  %s129_s25 = int_to_ptr.vmem [resolvable:$true] %s128_s25 }
   0xf   :  { %v59_v8 = vsel %vm51_vm0, %v48_v4, 0.0  ;;  %109 = vmatpush.msra.mxu0 %v82_v1  ;;  %v53_v9 = vrot.slane %v52_v7, 4  ;;  %v73_v12 = vsel %vm51_vm0, %v50_v6, 0.0  ;;  %v67_v14 = vrot.slane %v66_v11, 4  ;;  %v147_v39 = vld [vmem:[%s270_s2] ss:$0 sm:$0xff] }
  0x10   :  { %v60_v10 = vrot.slane %v59_v8, 4  ;;  %v74_v15 = vrot.slane %v73_v12, 4  ;;  %s130_s28 = sshll.u32 %s271_s3, 4  ;;  %s131_s28 = int_to_ptr.hbm [resolvable:$true] %s130_s28 }
  0x11   :  { %110 = vmatpush.msra.mxu0 %v81_v2  ;;  %v54_v16 = vadd.f32 %v53_v9, %v52_v7  ;;  %v68_v18 = vadd.f32 %v67_v14, %v66_v11 }
  0x12   :  { %v61_v17 = vadd.f32 %v60_v10, %v59_v8  ;;  %v75_v19 = vadd.f32 %v74_v15, %v73_v12 }
  0x13   :  { %111 = vmatpush.msra.mxu0 %v80_v13  ;;  %v55_v20 = vrot.slane %v54_v16, 2  ;;  %v69_v22 = vrot.slane %v68_v18, 2 }
  0x14   :  { %v62_v21 = vrot.slane %v61_v17, 2  ;;  %v76_v23 = vrot.slane %v75_v19, 2 }
  0x15   :  { %v56_v24 = vadd.f32 %v55_v20, %v54_v16  ;;  %v70_v26 = vadd.f32 %v69_v22, %v68_v18 }
  0x16   :  { %v63_v25 = vadd.f32 %v62_v21, %v61_v17  ;;  %v77_v27 = vadd.f32 %v76_v23, %v75_v19 }
  0x17   :  { %v57_v28 = vrot.slane %v56_v24, 1  ;;  %v71_v30 = vrot.slane %v70_v26, 1 }
  0x18   :  { %v64_v29 = vrot.slane %v63_v25, 1  ;;  %v78_v31 = vrot.slane %v77_v27, 1 }
  0x19   :  { %v58_v32 = vadd.f32 %v57_v28, %v56_v24  ;;  %v72_v34 = vadd.f32 %v71_v30, %v70_v26 }
  0x1a   :  { %v65_v33 = vadd.f32 %v64_v29, %v63_v25  ;;  %v79_v35 = vadd.f32 %v78_v31, %v77_v27 }
  0x1c   :  { %v89_v36 = vsel %vm88_vm1, %v65_v33, %v58_v32 }
  0x1d   :  { %v91_v37 = vsel %vm90_vm2, %v72_v34, %v89_v36 }
  0x1e   :  { %v93_v38 = vsel %vm92_vm3, %v79_v35, %v91_v37 }
  0x1f   :  { %141 = vmatmul.msk.f32.vlgmr.msra.gmra.mxu0 %vm51_vm0, %v93_v38 }
  0x9c   :  { %v113_v40 = vpop.f32.mrf.mxu0 }
  0x9d   :  { %v116_v41 = vmul.f32 0.125, %v113_v40 }
  0x9f   :  { %v121_v42 = vadd.f32 %v147_v39, %v116_v41 }
  0xa1   :  { %122 = vst [vmem:[#allocation7] sm:$0xf] %v121_v42 }
  0xa2   :  { %133 = dma.vmem_to_hbm [thread:$0]  %s129_s25, 64, %s131_s28, [#allocation4]  }
  0xa3   :  { %224 = dma.done.wait [#allocation4], 64  }
  0xa4   :  { %225 = vsyncadd [#allocation4], 4294967232 }
  0xa5   :  { %138 = vsyncpa [#allocation3], 1 }
  0xa6   :  { %139 = vsyncpa [#allocation6], 1 }
  0xa7   :  { %140 = vsyncpa [#allocation4], 1 }

</bundles_post_ra>
